<compile_context>
chip_gen: v7x
topology: tpu7x:2x2x1
jax: 0.10.0
libtpu: 0.0.40
codegen_flags: <defaults>
</compile_context>

<pallas_src>
import functools
import math

import jax
import jax.numpy as jnp
import numpy as np
from jax.experimental import pallas as pl
from jax.experimental.pallas import tpu as pltpu


# ----------------------------------------------------------------------------
# Kernel: apply the (locked) int8 mask with the 1/keep_prob rescale.
# Pure elementwise, HBM-bandwidth bound: x (dtype), mask (int8) in; y out.
# ----------------------------------------------------------------------------
def _locked_dropout_kernel(x_ref, m_ref, y_ref, *, inv_keep):
    x = x_ref[...].astype(jnp.float32)
    scale = m_ref[...].astype(jnp.float32) * jnp.float32(inv_keep)
    y_ref[...] = (x * scale).astype(y_ref.dtype)


def _apply_locked_dropout(x2d, mask_i8, keep_prob, *, block_rows=2048):
    """Row-tiled, double-buffered elementwise apply of the locked mask."""
    n, h = x2d.shape
    # Block rows: full extent when small, otherwise a multiple of 32 (valid
    # sublane tiling for f32 / bf16 / int8 alike).
    br = n if n <= block_rows else block_rows
    grid = (pl.cdiv(n, br),)
    kernel = functools.partial(_locked_dropout_kernel, inv_keep=1.0 / keep_prob)
    return pl.pallas_call(
        kernel,
        out_shape=jax.ShapeDtypeStruct((n, h), x2d.dtype),
        grid=grid,
        in_specs=[
            pl.BlockSpec((br, h), lambda i: (i, 0)),
            pl.BlockSpec((br, h), lambda i: (i, 0)),
        ],
        out_specs=pl.BlockSpec((br, h), lambda i: (i, 0)),
        compiler_params=pltpu.CompilerParams(
            dimension_semantics=("parallel",)
        ),
    )(x2d, mask_i8)


def _lane_dense_2d(x):
    """Flatten x to a lane-dense (rows, 128) slab when possible."""
    total = math.prod(x.shape)
    if total % 128 == 0:
        return x.reshape(total // 128, 128)
    # Fallback: keep the original last dim on lanes.
    return x.reshape(-1, x.shape[-1])


class LockedDropout:
    """JAX/Pallas port of the PyTorch LockedDropout module."""

    def __init__(self, seed=0):
        self.m = None                       # cached int8 mask, flattened 2-D
        self._key = jax.random.PRNGKey(seed)

    def reset_state(self):
        self.m = None

    def forward(self, x, dropout=0.5, train=True, block_rows=2048):
        if train is False:
            return x
        keep_prob = 1.0 - dropout
        orig_shape = x.shape
        x2d = _lane_dense_2d(x)

        if keep_prob <= 0.0:
            # dropout=1.0: every element dropped.  (PyTorch would compute
            # 0/0 = NaN here; we return zeros instead, see review.)
            self.m = jnp.zeros(x2d.shape, jnp.int8)
            return jnp.zeros_like(x)

        if self.m is None or self.m.shape != x2d.shape:
            # Sample the locked mask once.  Note: a keep_prob extremely close
            # to 1.0 has a negligible (~2^-32) bias from the underlying RNG.
            self.m = jax.random.bernoulli(
                self._key, keep_prob, x2d.shape
            ).astype(jnp.int8)

        y2d = _apply_locked_dropout(x2d, self.m, keep_prob, block_rows=block_rows)
        return y2d.reshape(orig_shape)


if __name__ == "__main__":
    key = jax.random.PRNGKey(0)
    T, B, H = 8, 2, 32  # time-major RNN activations (T*B*H = 512 -> (4, 128))
    x = jax.random.normal(key, (T, B, H), dtype=jnp.float32)

    ld = LockedDropout(seed=0)

    # eval path: identity
    y_eval = ld.forward(x, dropout=0.5, train=False)
    assert jnp.allclose(y_eval, x)

    # first training call: samples and caches the mask
    y1 = ld.forward(x, dropout=0.5, train=True)
    jax.block_until_ready(y1)

    # second training call: reuses the locked mask
    y2 = ld.forward(x, dropout=0.5, train=True)
    jax.block_until_ready(y2)

    # verify locked-mask semantics against the cached mask
    mask = np.asarray(ld.m).astype(np.float32).reshape(T, B, H)
    ref = mask / 0.5 * np.asarray(x)
    np.testing.assert_allclose(np.asarray(y1), ref, rtol=1e-6, atol=1e-6)
    np.testing.assert_allclose(np.asarray(y2), ref, rtol=1e-6, atol=1e-6)
    # mask is binary and "locked" across calls
    assert set(np.unique(mask)).issubset({0.0, 1.0})
    np.testing.assert_allclose(np.asarray(y1), np.asarray(y2), rtol=0, atol=0)

    # exercise the multi-block (tiled, double-buffered) path with a larger shape
    ld2 = LockedDropout(seed=1)
    T2, B2, H2 = 64, 4, 64  # total = 16384 -> (128, 128) rows x lanes
    x2 = jax.random.normal(jax.random.PRNGKey(1), (T2, B2, H2), dtype=jnp.float32)
    y2a = ld2.forward(x2, dropout=0.3, train=True, block_rows=32)  # grid of 4 tiles
    jax.block_until_ready(y2a)
    mask2 = np.asarray(ld2.m).astype(np.float32).reshape(T2, B2, H2)
    ref2 = mask2 / 0.7 * np.asarray(x2)
    np.testing.assert_allclose(np.asarray(y2a), ref2, rtol=1e-6, atol=1e-6)

    print("KERNEL_OK")
</pallas_src>

<mosaic_0001>
module attributes {stable_mosaic.version = 11 : i64} {
  func.func @_locked_dropout_kernel(%arg0: i32, %arg1: memref<4x128xf32, #tpu.memory_space<vmem>>, %arg2: memref<4x128xi8, #tpu.memory_space<vmem>>, %arg3: memref<4x128xf32, #tpu.memory_space<vmem>>) attributes {dimension_semantics = [#tpu.dimension_semantics<parallel>], iteration_bounds = array<i64: 1>, scalar_prefetch = 0 : i64, scratch_operands = 0 : i64, tpu.core_type = #tpu.core_type<tc>, window_params = [{transform_indices = @transform_0, window_bounds = array<i64: 4, 128>}, {transform_indices = @transform_1, window_bounds = array<i64: 4, 128>}, {transform_indices = @transform_2, window_bounds = array<i64: 4, 128>}]} {
    %c0 = arith.constant 0 : index
    %c0_0 = arith.constant 0 : index
    %0 = vector.load %arg1[%c0, %c0_0] : memref<4x128xf32, #tpu.memory_space<vmem>>, vector<4x128xf32>
    %c0_1 = arith.constant 0 : index
    %c0_2 = arith.constant 0 : index
    %1 = vector.load %arg2[%c0_1, %c0_2] : memref<4x128xi8, #tpu.memory_space<vmem>>, vector<4x128xi8>
    %2 = arith.sitofp %1 : vector<4x128xi8> to vector<4x128xf32>
    %cst = arith.constant 2.000000e+00 : f32
    %3 = vector.broadcast %cst : f32 to vector<4x128xf32>
    %4 = arith.mulf %2, %3 : vector<4x128xf32>
    %5 = arith.mulf %0, %4 : vector<4x128xf32>
    %c0_3 = arith.constant 0 : index
    %c0_4 = arith.constant 0 : index
    %6 = vector.load %arg3[%c0_3, %c0_4] : memref<4x128xf32, #tpu.memory_space<vmem>>, vector<4x128xf32>
    tpu.vector_store %arg3[%c0_3, %c0_4], %5 {strides = array<i32>} : memref<4x128xf32, #tpu.memory_space<vmem>>, vector<4x128xf32>,
    return
  }
  func.func @transform_0(%arg0: i32) -> (i32, i32) {
    %c0_i32 = arith.constant 0 : i32
    %c0_i32_0 = arith.constant 0 : i32
    return %arg0, %c0_i32 : i32, i32
  }
  func.func @transform_1(%arg0: i32) -> (i32, i32) {
    %c0_i32 = arith.constant 0 : i32
    %c0_i32_0 = arith.constant 0 : i32
    return %arg0, %c0_i32 : i32, i32
  }
  func.func @transform_2(%arg0: i32) -> (i32, i32) {
    %c0_i32 = arith.constant 0 : i32
    %c0_i32_0 = arith.constant 0 : i32
    return %arg0, %c0_i32 : i32, i32
  }
}

</mosaic_0001>

<bundles_post_ra>
// kernel: tpu_custom_call.1
= control target key start
LH: loop header
LB: loop body
LE: loop exit
PB: predicated region body
PF: predicated region fallthrough
CT: control target
= control target key end

     0   :  { %7 = vsyncpa [#allocation3], 0  ;;  %s140_s0 = inlined_call_operand.hbm [shape: f32[4,128], index: 0, kind: input, shape index: {}]   ;;  %s141_s1 = inlined_call_operand.vmem [shape: s8[4,128], index: 1, kind: input, shape index: {}]   ;;  %s142_s2 = inlined_call_operand.hbm [shape: f32[4,128], index: 2, kind: output, shape index: {}]  }
   0x1   :  { %8 = vsyncpa [#allocation4], 0  ;;  %s96_s9 = smov [#allocation2]   ;;  %s48_s13 = scalar_lea.hbm %s140_s0, 64 }
   0x2   :  { %s15_s10 = sshll.u32 %s96_s9, 4  ;;  %p49_p0 = scmp.ne.s32.totalorder %s140_s0, %s48_s13  ;;  %s16_s10 = int_to_ptr.vmem [resolvable:$true] %s15_s10 }
   0x3   :  { %p52_p1 = scmp.lt.u32.totalorder %s48_s13, %s140_s0 }
   0x5   :  { %p54_p2 = pnand %p52_p1, %p49_p0 }
   0x7   :  { %57 = shalt.err (!%p54_p2)
}
   0x8   :  { %s58_s18 = scalar_lea.vmem %s16_s10, 64  ;;  %p63_p4 = scmp.lt.s32.totalorder %s16_s10, %s16_s10 }
   0x9   :  { %p59_p3 = scmp.ne.s32.totalorder %s16_s10, %s58_s18  ;;  %p64_p5 = scmp.lt.s32.totalorder %s58_s18, %s58_s18 }
   0xb   :  { %p65_p6 = por %p64_p5, %p63_p4 }
   0xd   :  { %p66_p7 = pnand %p65_p6, %p59_p3 }
   0xf   :  { %69 = shalt.err (!%p66_p7)
}
  0x10   :  { %18 = dma.hbm_to_vmem [thread:$0]  %s140_s0, 64, %s16_s10, [#allocation3]  }
  0x11   :  { %92 = dma.done.wait [#allocation3], 64  }
  0x12   :  { %93 = vsyncadd [#allocation3], 4294967232  ;;  %v25_v0 = vld [vmem:[%s141_s1] sm:$0x1]  ;;  %s97_s23 = smov [#allocation5]  }
  0x13   :  { %v26_v1 = vunpack.c.0.s8 %v25_v0  ;;  %v24_v3 = vld [vmem:[#allocation2] sm:$0xf]  ;;  %s37_s24 = sshll.u32 %s97_s23, 4  ;;  %s38_s24 = int_to_ptr.vmem [resolvable:$true] %s37_s24 }
  0x14   :  { %s70_s25 = scalar_lea.vmem %s38_s24, 64  ;;  %p75_p9 = scmp.lt.s32.totalorder %s38_s24, %s38_s24 }
  0x15   :  { %v27_v2 = vcvt.s32.f32 %v26_v1  ;;  %p71_p8 = scmp.ne.s32.totalorder %s38_s24, %s70_s25  ;;  %p76_p10 = scmp.lt.s32.totalorder %s70_s25, %s70_s25 }
  0x17   :  { %v28_v4 = vmul.f32 2.0, %v27_v2  ;;  %p77_p11 = por %p76_p10, %p75_p9 }
  0x19   :  { %v29_v5 = vmul.f32 %v28_v4, %v24_v3  ;;  %p78_p12 = pnand %p77_p11, %p71_p8 }
  0x1b   :  { %30 = vst [vmem:[#allocation5] sm:$0xf] %v29_v5 }
  0x1c   :  { %81 = shalt.err (!%p78_p12)
}
  0x1d   :  { %s82_s1 = scalar_lea.hbm %s142_s2, 64 }
  0x1e   :  { %p83_p13 = scmp.ne.s32.totalorder %s142_s2, %s82_s1  ;;  %p86_p0 = scmp.lt.u32.totalorder %s82_s1, %s142_s2 }
  0x20   :  { %p88_p1 = pnand %p86_p0, %p83_p13 }
  0x22   :  { %91 = shalt.err (!%p88_p1)
}
  0x23   :  { %40 = dma.vmem_to_hbm [thread:$0]  %s38_s24, 64, %s142_s2, [#allocation4]  }
  0x24   :  { %94 = dma.done.wait [#allocation4], 64  }
  0x25   :  { %95 = vsyncadd [#allocation4], 4294967232 }
  0x26   :  { %44 = vsyncpa [#allocation3], 1 }
  0x27   :  { %45 = vsyncpa [#allocation4], 1 }

</bundles_post_ra>
